<compile_context>
chip_gen: v7x
topology: tpu7x:2x2x1
jax: 0.10.0
libtpu: 0.0.40
codegen_flags: <defaults>
</compile_context>

<pallas_src>
import functools

import jax
import jax.numpy as jnp
from jax import lax
from jax.experimental import pallas as pl
from jax.experimental.pallas import tpu as pltpu

NUM_CLASSES = 12   # make_one_hot(C=12)
EPS = 1.0          # smp.utils.losses.DiceLoss default eps
LANES = 128


def _round_up(x, m):
    return ((x + m - 1) // m) * m


def _cdiv(a, b):
    return -(-a // b)


def _dice_tp_kernel(x_ref, t_ref, tp_ref, *, num_classes, num_chunks, chunk):
    # x_ref:  (C, tile_rows, 128) logits, native dtype, lane-dense spatial tiles
    # t_ref:  (tile_rows, 128)    i32 labels; padded / out-of-range pixels = -1
    # tp_ref: (8, 128) i32 per-(batch, parallel-slice) partial count of
    #         (argmax_c x == label); cross-lane reduce happens in the wrapper.
    @pl.when(pl.program_id(2) == 0)
    def _init():
        tp_ref[...] = jnp.zeros_like(tp_ref)

    def chunk_tp(r0):
        # Unrolled running argmax over channels (strict >: first max wins,
        # matching argmax tie-breaking).  Pure VPU max/select, no XLU.
        t = t_ref[pl.ds(r0, chunk), :]
        m = x_ref[0, pl.ds(r0, chunk), :]
        amax = jnp.zeros(t.shape, jnp.int32)
        for c in range(1, num_classes):
            xc = x_ref[c, pl.ds(r0, chunk), :]
            upd = xc > m
            m = jnp.where(upd, xc, m)
            amax = jnp.where(upd, jnp.int32(c), amax)
        hit = (amax == t).astype(jnp.int32)     # padded t == -1 never matches
        folded = hit[0:8, :]                    # (chunk,128) -> (8,128), VPU adds
        for r in range(8, chunk, 8):
            folded = folded + hit[r:r + 8, :]
        return folded

    if num_chunks == 1:
        tp_ref[...] += chunk_tp(0)
    else:
        # fori_loop bounds the live vreg set to one chunk regardless of tile size.
        def body(i, acc):
            return acc + chunk_tp(pl.multiple_of(i * chunk, chunk))
        tp_ref[...] += lax.fori_loop(0, num_chunks, body,
                                     jnp.zeros((8, LANES), jnp.int32))


def dice_loss(inputs, target, *, tile_rows=1024, eps=EPS):
    """inputs: (N, C, H, W) float logits (f32/bf16); target: (N, H, W) int labels."""
    N, C, H, W = inputs.shape
    HW = H * W

    # sum(gt) / sum(pr) need no big kernel work:
    #   sum(pr) = one argmax per pixel = N*H*W;  sum(gt) = #labels in [0, C).
    gt_sum = jnp.sum(jnp.logical_and(target >= 0, target < C)).astype(jnp.float32)
    pr_sum = jnp.float32(N * H * W)

    # Lane-dense layout: flat pixels -> (rows, 128).  Logits keep their native
    # dtype and are only padded up to a multiple of `sub`*128 pixels (sub = 8
    # for f32, 16 for bf16) — NOT up to a tile multiple.
    itemsize = jnp.dtype(inputs.dtype).itemsize
    sub = 8 * max(1, 4 // itemsize)
    rows_p = max(sub, _round_up(_cdiv(HW, LANES), sub))
    hw_p = rows_p * LANES

    x = inputs.reshape(N, C, HW)                      # no dtype cast
    t = target.astype(jnp.int32).reshape(N, HW)
    if hw_p != HW:
        # Only triggers for ragged H*W (e.g. not a multiple of 1024 pixels for
        # f32); typical segmentation shapes skip this copy entirely.
        x = jnp.pad(x, ((0, 0), (0, 0), (0, hw_p - HW)))

    # Tile sizing: as large as requested, chunked for compute.
    tr = min(tile_rows, rows_p)
    if tr >= 64:
        tr = (tr // 64) * 64
        chunk = 64
    else:
        tr = _round_up(tr, sub)
        chunk = tr
    num_chunks = tr // chunk

    num_tiles = _cdiv(rows_p, tr)
    n_par = 2 if num_tiles >= 2 else 1                # keep both v7x TCs busy
    tiles_per_par = _cdiv(num_tiles, n_par)
    rows_t = n_par * tiles_per_par * tr               # target padded extent

    # Pad only the (12x smaller) target with -1 out to the full tiled extent;
    # any garbage / duplicated logits in that region can never match -1.
    if rows_t * LANES != HW:
        t = jnp.pad(t, ((0, 0), (0, rows_t * LANES - HW)), constant_values=-1)

    x = x.reshape(N, C, rows_p, LANES)
    t = t.reshape(N, rows_t, LANES)

    if n_par * tiles_per_par == num_tiles:
        x_map = lambda b, p, s: (b, 0, p * tiles_per_par + s, 0)
    else:
        # Clamp surplus tiles of the odd split onto the last real logits tile;
        # their target rows are all -1, so they contribute nothing.
        x_map = lambda b, p, s: (
            b, 0, jnp.minimum(p * tiles_per_par + s, num_tiles - 1), 0)
    t_map = lambda b, p, s: (b, p * tiles_per_par + s, 0)
    o_map = lambda b, p, s: (b, p, 0, 0)

    tp_out = pl.pallas_call(
        functools.partial(_dice_tp_kernel, num_classes=C,
                          num_chunks=num_chunks, chunk=chunk),
        out_shape=jax.ShapeDtypeStruct((N, n_par, 8, LANES), jnp.int32),
        grid_spec=pltpu.PrefetchScalarGridSpec(
            num_scalar_prefetch=0,
            grid=(N, n_par, tiles_per_par),
            in_specs=[
                pl.BlockSpec((None, C, tr, LANES), x_map),
                pl.BlockSpec((None, tr, LANES), t_map),
            ],
            out_specs=pl.BlockSpec((None, None, 8, LANES), o_map),
        ),
        compiler_params=pltpu.CompilerParams(
            dimension_semantics=("parallel", "parallel", "arbitrary"),
            # 32 MiB: raises v5e's 16 MiB scoped default for the large tiles,
            # stays within v7x's 32 MiB scoped / 64 MiB physical VMEM.
            vmem_limit_bytes=32 * 1024 * 1024,
        ),
    )(x, t)

    # Final cross-lane reduction + dice algebra (int32 counts, exact).
    tp = jnp.sum(tp_out).astype(jnp.float32)          # sum(pr * gt)
    fp = pr_sum - tp
    fn = gt_sum - tp
    score = (2.0 * tp + eps) / (2.0 * tp + fn + fp + eps)
    return 1.0 - score


def _dice_loss_ref(inputs, target):
    """Pure-JAX reference for sanity checking."""
    N, C, H, W = inputs.shape
    amax = jnp.argmax(inputs, axis=1, keepdims=True)                 # N,1,H,W
    ch = jax.lax.broadcasted_iota(jnp.int32, (N, C, H, W), 1)
    pr = (ch == amax).astype(jnp.float32)
    gt = (ch == target[:, None, :, :].astype(jnp.int32)).astype(jnp.float32)
    tp = jnp.sum(pr * gt)
    fp = jnp.sum(pr) - tp
    fn = jnp.sum(gt) - tp
    return 1.0 - (2.0 * tp + EPS) / (2.0 * tp + fn + fp + EPS)


if __name__ == "__main__":
    key = jax.random.PRNGKey(0)

    def check(name, key, N, H, W, dtype=jnp.float32, **kw):
        k1, k2 = jax.random.split(key)
        C = NUM_CLASSES
        inputs = jax.random.normal(k1, (N, C, H, W), dtype=dtype)
        target = jax.random.randint(k2, (N, H, W), 0, C, dtype=jnp.int32)
        loss = jax.block_until_ready(dice_loss(inputs, target, **kw))
        ref = _dice_loss_ref(inputs, target)
        assert jnp.allclose(loss, ref, atol=1e-6), (name, loss, ref)

    keys = jax.random.split(key, 6)
    # 1. small canonical shape, f32, single tile.
    check("f32_16", keys[0], N=2, H=16, W=16)
    # 2. same shape, native bf16 streaming path (no f32 cast).
    check("bf16_16", keys[1], N=2, H=16, W=16, dtype=jnp.bfloat16)
    # 3. ragged H*W + 2-way parallel spatial split.
    check("ragged_40", keys[2], N=2, H=40, W=40, tile_rows=8)
    # 4. partial (out-of-bounds) last logits block, chunk=64, N=1.
    check("partial_96", keys[3], N=1, H=96, W=96)
    # 5. odd tile count -> clamped duplicate tile on the parallel split.
    check("clamp_48", keys[4], N=2, H=48, W=48, tile_rows=8)
    # 6. multi-chunk fori_loop path (tile_rows=128, two 64-row chunks).
    check("chunks_128", keys[5], N=1, H=128, W=128)

    print("KERNEL_OK")
</pallas_src>

<mosaic_0001>
module attributes {stable_mosaic.version = 11 : i64} {
  func.func @_dice_tp_kernel(%arg0: i32, %arg1: i32, %arg2: i32, %arg3: memref<1x12x8x128xf32, #tpu.memory_space<vmem>>, %arg4: memref<1x8x128xi32, #tpu.memory_space<vmem>>, %arg5: memref<1x1x8x128xi32, #tpu.memory_space<vmem>>) attributes {dimension_semantics = [#tpu.dimension_semantics<parallel>, #tpu.dimension_semantics<parallel>, #tpu.dimension_semantics<arbitrary>], iteration_bounds = array<i64: 2, 1, 1>, scalar_prefetch = 0 : i64, scratch_operands = 0 : i64, tpu.core_type = #tpu.core_type<tc>, window_params = [{transform_indices = @transform_0, window_bounds = array<i64: 1, 12, 8, 128>}, {transform_indices = @transform_1, window_bounds = array<i64: 1, 8, 128>}, {transform_indices = @transform_2, window_bounds = array<i64: 1, 1, 8, 128>}]} {
    %c0_i32 = arith.constant 0 : i32
    %0 = arith.cmpi eq, %arg2, %c0_i32 : i32
    %1 = arith.extui %0 : i1 to i32
    %c0_i32_0 = arith.constant 0 : i32
    %2 = arith.cmpi ne, %1, %c0_i32_0 : i32
    scf.if %2 {
      %c0_i32_49 = arith.constant 0 : i32
      %81 = vector.broadcast %c0_i32_49 : i32 to vector<8x128xi32>
      %c0_50 = arith.constant 0 : index
      %c0_51 = arith.constant 0 : index
      %c0_52 = arith.constant 0 : index
      %c0_53 = arith.constant 0 : index
      %82 = vector.load %arg5[%c0_50, %c0_51, %c0_52, %c0_53] : memref<1x1x8x128xi32, #tpu.memory_space<vmem>>, vector<1x1x8x128xi32>
      %83 = vector.shape_cast %82 : vector<1x1x8x128xi32> to vector<8x128xi32>
      %84 = vector.shape_cast %81 : vector<8x128xi32> to vector<1x1x8x128xi32>
      tpu.vector_store %arg5[%c0_50, %c0_51, %c0_52, %c0_53], %84 {strides = array<i32>} : memref<1x1x8x128xi32, #tpu.memory_space<vmem>>, vector<1x1x8x128xi32>,
    } else {
    }
    %c0 = arith.constant 0 : index
    %c0_1 = arith.constant 0 : index
    %c0_2 = arith.constant 0 : index
    %c0_3 = arith.constant 0 : index
    %3 = vector.load %arg5[%c0, %c0_1, %c0_2, %c0_3] : memref<1x1x8x128xi32, #tpu.memory_space<vmem>>, vector<1x1x8x128xi32>
    %4 = vector.shape_cast %3 : vector<1x1x8x128xi32> to vector<8x128xi32>
    %c0_4 = arith.constant 0 : index
    %c0_5 = arith.constant 0 : index
    %c0_6 = arith.constant 0 : index
    %5 = vector.load %arg4[%c0_4, %c0_5, %c0_6] : memref<1x8x128xi32, #tpu.memory_space<vmem>>, vector<1x8x128xi32>
    %6 = vector.shape_cast %5 : vector<1x8x128xi32> to vector<8x128xi32>
    %c0_7 = arith.constant 0 : index
    %c0_8 = arith.constant 0 : index
    %c0_9 = arith.constant 0 : index
    %c0_10 = arith.constant 0 : index
    %7 = vector.load %arg3[%c0_7, %c0_8, %c0_9, %c0_10] : memref<1x12x8x128xf32, #tpu.memory_space<vmem>>, vector<1x1x8x128xf32>
    %8 = vector.shape_cast %7 : vector<1x1x8x128xf32> to vector<8x128xf32>
    %c0_i32_11 = arith.constant 0 : i32
    %9 = vector.broadcast %c0_i32_11 : i32 to vector<8x128xi32>
    %c0_12 = arith.constant 0 : index
    %c1 = arith.constant 1 : index
    %c0_13 = arith.constant 0 : index
    %c0_14 = arith.constant 0 : index
    %10 = vector.load %arg3[%c0_12, %c1, %c0_13, %c0_14] : memref<1x12x8x128xf32, #tpu.memory_space<vmem>>, vector<1x1x8x128xf32>
    %11 = vector.shape_cast %10 : vector<1x1x8x128xf32> to vector<8x128xf32>
    %12 = arith.cmpf ogt, %11, %8 : vector<8x128xf32>
    %13 = arith.select %12, %11, %8 : vector<8x128xi1>, vector<8x128xf32>
    %c1_i32 = arith.constant 1 : i32
    %14 = vector.broadcast %c1_i32 : i32 to vector<8x128xi32>
    %15 = arith.select %12, %14, %9 : vector<8x128xi1>, vector<8x128xi32>
    %c0_15 = arith.constant 0 : index
    %c2 = arith.constant 2 : index
    %c0_16 = arith.constant 0 : index
    %c0_17 = arith.constant 0 : index
    %16 = vector.load %arg3[%c0_15, %c2, %c0_16, %c0_17] : memref<1x12x8x128xf32, #tpu.memory_space<vmem>>, vector<1x1x8x128xf32>
    %17 = vector.shape_cast %16 : vector<1x1x8x128xf32> to vector<8x128xf32>
    %18 = arith.cmpf ogt, %17, %13 : vector<8x128xf32>
    %19 = arith.select %18, %17, %13 : vector<8x128xi1>, vector<8x128xf32>
    %c2_i32 = arith.constant 2 : i32
    %20 = vector.broadcast %c2_i32 : i32 to vector<8x128xi32>
    %21 = arith.select %18, %20, %15 : vector<8x128xi1>, vector<8x128xi32>
    %c0_18 = arith.constant 0 : index
    %c3 = arith.constant 3 : index
    %c0_19 = arith.constant 0 : index
    %c0_20 = arith.constant 0 : index
    %22 = vector.load %arg3[%c0_18, %c3, %c0_19, %c0_20] : memref<1x12x8x128xf32, #tpu.memory_space<vmem>>, vector<1x1x8x128xf32>
    %23 = vector.shape_cast %22 : vector<1x1x8x128xf32> to vector<8x128xf32>
    %24 = arith.cmpf ogt, %23, %19 : vector<8x128xf32>
    %25 = arith.select %24, %23, %19 : vector<8x128xi1>, vector<8x128xf32>
    %c3_i32 = arith.constant 3 : i32
    %26 = vector.broadcast %c3_i32 : i32 to vector<8x128xi32>
    %27 = arith.select %24, %26, %21 : vector<8x128xi1>, vector<8x128xi32>
    %c0_21 = arith.constant 0 : index
    %c4 = arith.constant 4 : index
    %c0_22 = arith.constant 0 : index
    %c0_23 = arith.constant 0 : index
    %28 = vector.load %arg3[%c0_21, %c4, %c0_22, %c0_23] : memref<1x12x8x128xf32, #tpu.memory_space<vmem>>, vector<1x1x8x128xf32>
    %29 = vector.shape_cast %28 : vector<1x1x8x128xf32> to vector<8x128xf32>
    %30 = arith.cmpf ogt, %29, %25 : vector<8x128xf32>
    %31 = arith.select %30, %29, %25 : vector<8x128xi1>, vector<8x128xf32>
    %c4_i32 = arith.constant 4 : i32
    %32 = vector.broadcast %c4_i32 : i32 to vector<8x128xi32>
    %33 = arith.select %30, %32, %27 : vector<8x128xi1>, vector<8x128xi32>
    %c0_24 = arith.constant 0 : index
    %c5 = arith.constant 5 : index
    %c0_25 = arith.constant 0 : index
    %c0_26 = arith.constant 0 : index
    %34 = vector.load %arg3[%c0_24, %c5, %c0_25, %c0_26] : memref<1x12x8x128xf32, #tpu.memory_space<vmem>>, vector<1x1x8x128xf32>
    %35 = vector.shape_cast %34 : vector<1x1x8x128xf32> to vector<8x128xf32>
    %36 = arith.cmpf ogt, %35, %31 : vector<8x128xf32>
    %37 = arith.select %36, %35, %31 : vector<8x128xi1>, vector<8x128xf32>
    %c5_i32 = arith.constant 5 : i32
    %38 = vector.broadcast %c5_i32 : i32 to vector<8x128xi32>
    %39 = arith.select %36, %38, %33 : vector<8x128xi1>, vector<8x128xi32>
    %c0_27 = arith.constant 0 : index
    %c6 = arith.constant 6 : index
    %c0_28 = arith.constant 0 : index
    %c0_29 = arith.constant 0 : index
    %40 = vector.load %arg3[%c0_27, %c6, %c0_28, %c0_29] : memref<1x12x8x128xf32, #tpu.memory_space<vmem>>, vector<1x1x8x128xf32>
    %41 = vector.shape_cast %40 : vector<1x1x8x128xf32> to vector<8x128xf32>
    %42 = arith.cmpf ogt, %41, %37 : vector<8x128xf32>
    %43 = arith.select %42, %41, %37 : vector<8x128xi1>, vector<8x128xf32>
    %c6_i32 = arith.constant 6 : i32
    %44 = vector.broadcast %c6_i32 : i32 to vector<8x128xi32>
    %45 = arith.select %42, %44, %39 : vector<8x128xi1>, vector<8x128xi32>
    %c0_30 = arith.constant 0 : index
    %c7 = arith.constant 7 : index
    %c0_31 = arith.constant 0 : index
    %c0_32 = arith.constant 0 : index
    %46 = vector.load %arg3[%c0_30, %c7, %c0_31, %c0_32] : memref<1x12x8x128xf32, #tpu.memory_space<vmem>>, vector<1x1x8x128xf32>
    %47 = vector.shape_cast %46 : vector<1x1x8x128xf32> to vector<8x128xf32>
    %48 = arith.cmpf ogt, %47, %43 : vector<8x128xf32>
    %49 = arith.select %48, %47, %43 : vector<8x128xi1>, vector<8x128xf32>
    %c7_i32 = arith.constant 7 : i32
    %50 = vector.broadcast %c7_i32 : i32 to vector<8x128xi32>
    %51 = arith.select %48, %50, %45 : vector<8x128xi1>, vector<8x128xi32>
    %c0_33 = arith.constant 0 : index
    %c8 = arith.constant 8 : index
    %c0_34 = arith.constant 0 : index
    %c0_35 = arith.constant 0 : index
    %52 = vector.load %arg3[%c0_33, %c8, %c0_34, %c0_35] : memref<1x12x8x128xf32, #tpu.memory_space<vmem>>, vector<1x1x8x128xf32>
    %53 = vector.shape_cast %52 : vector<1x1x8x128xf32> to vector<8x128xf32>
    %54 = arith.cmpf ogt, %53, %49 : vector<8x128xf32>
    %55 = arith.select %54, %53, %49 : vector<8x128xi1>, vector<8x128xf32>
    %c8_i32 = arith.constant 8 : i32
    %56 = vector.broadcast %c8_i32 : i32 to vector<8x128xi32>
    %57 = arith.select %54, %56, %51 : vector<8x128xi1>, vector<8x128xi32>
    %c0_36 = arith.constant 0 : index
    %c9 = arith.constant 9 : index
    %c0_37 = arith.constant 0 : index
    %c0_38 = arith.constant 0 : index
    %58 = vector.load %arg3[%c0_36, %c9, %c0_37, %c0_38] : memref<1x12x8x128xf32, #tpu.memory_space<vmem>>, vector<1x1x8x128xf32>
    %59 = vector.shape_cast %58 : vector<1x1x8x128xf32> to vector<8x128xf32>
    %60 = arith.cmpf ogt, %59, %55 : vector<8x128xf32>
    %61 = arith.select %60, %59, %55 : vector<8x128xi1>, vector<8x128xf32>
    %c9_i32 = arith.constant 9 : i32
    %62 = vector.broadcast %c9_i32 : i32 to vector<8x128xi32>
    %63 = arith.select %60, %62, %57 : vector<8x128xi1>, vector<8x128xi32>
    %c0_39 = arith.constant 0 : index
    %c10 = arith.constant 10 : index
    %c0_40 = arith.constant 0 : index
    %c0_41 = arith.constant 0 : index
    %64 = vector.load %arg3[%c0_39, %c10, %c0_40, %c0_41] : memref<1x12x8x128xf32, #tpu.memory_space<vmem>>, vector<1x1x8x128xf32>
    %65 = vector.shape_cast %64 : vector<1x1x8x128xf32> to vector<8x128xf32>
    %66 = arith.cmpf ogt, %65, %61 : vector<8x128xf32>
    %67 = arith.select %66, %65, %61 : vector<8x128xi1>, vector<8x128xf32>
    %c10_i32 = arith.constant 10 : i32
    %68 = vector.broadcast %c10_i32 : i32 to vector<8x128xi32>
    %69 = arith.select %66, %68, %63 : vector<8x128xi1>, vector<8x128xi32>
    %c0_42 = arith.constant 0 : index
    %c11 = arith.constant 11 : index
    %c0_43 = arith.constant 0 : index
    %c0_44 = arith.constant 0 : index
    %70 = vector.load %arg3[%c0_42, %c11, %c0_43, %c0_44] : memref<1x12x8x128xf32, #tpu.memory_space<vmem>>, vector<1x1x8x128xf32>
    %71 = vector.shape_cast %70 : vector<1x1x8x128xf32> to vector<8x128xf32>
    %72 = arith.cmpf ogt, %71, %67 : vector<8x128xf32>
    %c11_i32 = arith.constant 11 : i32
    %73 = vector.broadcast %c11_i32 : i32 to vector<8x128xi32>
    %74 = arith.select %72, %73, %69 : vector<8x128xi1>, vector<8x128xi32>
    %75 = arith.cmpi eq, %74, %6 : vector<8x128xi32>
    %76 = arith.extui %75 : vector<8x128xi1> to vector<8x128xi32>
    %77 = arith.addi %4, %76 : vector<8x128xi32>
    %c0_45 = arith.constant 0 : index
    %c0_46 = arith.constant 0 : index
    %c0_47 = arith.constant 0 : index
    %c0_48 = arith.constant 0 : index
    %78 = vector.load %arg5[%c0_45, %c0_46, %c0_47, %c0_48] : memref<1x1x8x128xi32, #tpu.memory_space<vmem>>, vector<1x1x8x128xi32>
    %79 = vector.shape_cast %78 : vector<1x1x8x128xi32> to vector<8x128xi32>
    %80 = vector.shape_cast %77 : vector<8x128xi32> to vector<1x1x8x128xi32>
    tpu.vector_store %arg5[%c0_45, %c0_46, %c0_47, %c0_48], %80 {strides = array<i32>} : memref<1x1x8x128xi32, #tpu.memory_space<vmem>>, vector<1x1x8x128xi32>,
    return
  }
  func.func @transform_0(%arg0: i32, %arg1: i32, %arg2: i32) -> (i32, i32, i32, i32) {
    %c1_i32 = arith.constant 1 : i32
    %0 = arith.muli %arg1, %c1_i32 : i32
    %1 = arith.addi %0, %arg2 : i32
    %c0_i32 = arith.constant 0 : i32
    %c0_i32_0 = arith.constant 0 : i32
    %c0_i32_1 = arith.constant 0 : i32
    return %arg0, %c0_i32, %1, %c0_i32_0 : i32, i32, i32, i32
  }
  func.func @transform_1(%arg0: i32, %arg1: i32, %arg2: i32) -> (i32, i32, i32) {
    %c1_i32 = arith.constant 1 : i32
    %0 = arith.muli %arg1, %c1_i32 : i32
    %1 = arith.addi %0, %arg2 : i32
    %c0_i32 = arith.constant 0 : i32
    %c0_i32_0 = arith.constant 0 : i32
    return %arg0, %1, %c0_i32 : i32, i32, i32
  }
  func.func @transform_2(%arg0: i32, %arg1: i32, %arg2: i32) -> (i32, i32, i32, i32) {
    %c0_i32 = arith.constant 0 : i32
    %c0_i32_0 = arith.constant 0 : i32
    %c0_i32_1 = arith.constant 0 : i32
    return %arg0, %arg1, %c0_i32, %c0_i32_0 : i32, i32, i32, i32
  }
}

</mosaic_0001>

<bundles_post_ra>
// kernel: tpu_custom_call.1
= control target key start
LH: loop header
LB: loop body
LE: loop exit
PB: predicated region body
PF: predicated region fallthrough
CT: control target
= control target key end

     0   :  { %7 = vsyncpa [#allocation3], 0  ;;  %s928_s0 = inlined_call_operand.hbm [shape: f32[2,12,8,128], index: 0, kind: input, shape index: {}]   ;;  %s929_s1 = inlined_call_operand.hbm [shape: s32[2,8,128], index: 1, kind: input, shape index: {}]   ;;  %s930_s2 = inlined_call_operand.hbm [shape: s32[2,1,8,128], index: 2, kind: output, shape index: {}]  }
   0x1   :  { %9 = vsyncpa [#allocation3 + $0x1], 0 }
   0x2   :  { %10 = vsyncpa [#allocation6], 0 }
   0x3   :  { %12 = vsyncpa [#allocation6 + $0x1], 0 }
   0x4   :  { %13 = vsyncpa [#allocation4], 0 }
   0x5   :  { %15 = vsyncpa [#allocation4 + $0x1], 0  ;;  %s692_s9 = smov 0   ;;  %s694_s10 = smov 0  }
   0x6   :  { %s696_s11 = smov 0   ;;  %s698_s12 = smov 0  }
   0x7   :  { %s700_s13 = smov 0   ;;  %s702_s14 = smov 0  }
   0x8 LB: > { %s425_s15 = sadd.s32 4294967295, %s669_s14   ;;  %s426_s16 = sadd.s32 4294967294, %s669_s14   ;;  %s669_s14 = sphi %s702_s14, %s21_s14   ;;  %s665_s13 = sphi %s700_s13, %s949_s13   ;;  %s661_s12 = sphi %s698_s12, %s948_s12   ;;  %s657_s11 = sphi %s696_s11, %s947_s11   ;;  %s653_s10 = sphi %s694_s10, %s946_s10   ;;  %s649_s9 = sphi %s692_s9, %s945_s9  }
   0x9   : > { %s40_s17 = sadd.s32 1, %s665_s13  ;;  %s51_s18 = sadd.s32 1, %s657_s11 }
   0xa   : > { %p42_p0 = scmp.ge.s32.totalorder %s40_s17, 2  ;;  %p58_p1 = scmp.ne.s32.totalorder %s657_s11, %s653_s10 }
   0xb   : > { %p59_p2 = scmp.eq.s32.totalorder %s669_s14, 0  ;;  %p64_p3 = scmp.ne.s32.totalorder %s653_s10, %s649_s9 }
   0xc   : > { %s951_s17 = smov (%p42_p0, %s40_s17), 0  ;;  %p65_p5 = scmp.eq.s32.totalorder %s425_s15, 0 }
   0xd   : > { %p733_p4 = por %p59_p2, %p58_p1  ;;  %s46_s20 = ssub.s32 %s665_s13, %s951_s17 }
   0xe   : > { %p120_p6 = scmp.eq.s32.totalorder %s425_s15, 1  ;;  %p49_p7 = scmp.eq.s32.totalorder %s46_s20, 0 }
   0xf   : > { %p739_p8 = por %p65_p5, %p64_p3  ;;  %p126_p10 = scmp.eq.s32.totalorder %s426_s16, 1 }
  0x10   : > { %p743_p9 = por %p120_p6, %p58_p1  ;;  %p470_p13 = scmp.lt.s32.totalorder %s669_s14, 2 }
  0x11   : > { %s934_s21 = scalar_select %p739_p8, 1, 0 }
  0x12   : > { %s935_s22 = scalar_select %p743_p9, 1, 0 }
  0x13   : > { %s748_s23 = scalar_select %p49_p7, %s657_s11, %s51_s18  }
  0x14   : > { %p750_p11 = por %p126_p10, %p64_p3  ;;  %s757_s25 = sand.u32 1, %s657_s11  }
  0x15   : > { %s450_s26 = smul.u32 96, %s757_s25  ;;  %p763_p0 = pnand %p470_p13, %p733_p4 }
  0x16   : > { %s936_s24 = scalar_select %p750_p11, 1, 0 }
  0x17   : > { %s451_s27 = smul.u32 1536, %s665_s13  ;;  %s150_s4 = scalar_lea.vmem [#allocation2], %s450_s26 }
  0x18   : > { %s159_s5 = sshll.u32 %s150_s4, 4  ;;  %s147_s6 = scalar_lea.sflag [#allocation3], %s757_s25  ;;  %s772_s5 = int_to_ptr.vmem [resolvable:$true] %s159_s5 }
  0x19   : > { %s770_s3 = scalar_lea.hbm %s928_s0, %s451_s27  ;;  %p525_p3 = pneg %p763_p0 }
  0x1a   : > { %s523_s7 = scalar_lea.hbm %s770_s3, 1536  ;;  %s528_s16 = scalar_lea.hbm %s928_s0, 3072 }
  0x1b   : > { %p524_p2 = scmp.ne.s32.totalorder %s770_s3, %s523_s7  ;;  %p529_p6 = scmp.lt.u32.totalorder %s770_s3, %s928_s0 }
  0x1c   : > { %p530_p7 = scmp.lt.u32.totalorder %s528_s16, %s523_s7  ;;  %p532_p13 = scmp.lt.u32.totalorder %s523_s7, %s770_s3 }
  0x1d   : > { %p526_p4 = pnand %p525_p3, %p524_p2 }
  0x1e   : > { %p531_p10 = por %p530_p7, %p529_p6 }
  0x1f   : > { %p527_p5 = pneg %p526_p4 }
  0x20   : > { %p533_p12 = por %p532_p13, %p531_p10 }
  0x22   : > { %p534_p1 = pnand %p533_p12, %p527_p5 }
  0x24   : > { %537 = shalt.err (!%p534_p1)
}
  0x25   : > { %s538_s20 = scalar_lea.vmem %s772_s5, 1536  ;;  %s671_s26 = smov [#allocation2]  }
  0x26   : > { %p539_p2 = scmp.ne.s32.totalorder %s772_s5, %s538_s20  ;;  %s543_s27 = sshll.u32 %s671_s26, 4  ;;  %s544_s27 = int_to_ptr.vmem [resolvable:$false] %s543_s27 }
  0x27   : > { %s545_s29 = scalar_lea.vmem %s544_s27, 3072  ;;  %p546_p9 = scmp.lt.s32.totalorder %s772_s5, %s544_s27 }
  0x28   : > { %p541_p4 = pnand %p539_p2, %p525_p3  ;;  %p547_p6 = scmp.lt.s32.totalorder %s545_s29, %s538_s20 }
  0x2a   : > { %p542_p11 = pneg %p541_p4  ;;  %p548_p7 = por %p547_p6, %p546_p9 }
  0x2c   : > { %p549_p10 = pnand %p548_p7, %p542_p11 }
  0x2e   : > { %552 = shalt.err (!%p549_p10)
}
  0x2f   : > { %s672_s30 = smov 128   ;;  %s673_s4 = smov 8  }
  0x30   : > { %462 = dma.hbm_to_vmem [thread:$0]  (!%p763_p0), %s770_s3, 1536, %s772_s5, %s147_s6, %s672_s30, %s672_s30, %s673_s4  }
  0x31   : > { %p187_p12 = scmp.lt.s32.totalorder %s669_s14, 3  ;;  %s430_s7 = sshll.u32 %s757_s25, 3 }
  0x32   : > { %s431_s8 = sshll.u32 %s665_s13, 7  ;;  %p938_p9 = scmp.ge.s32.totalorder %s669_s14, 1 }
  0x33   : > { %s815_s19 = scalar_lea.hbm %s929_s1, %s431_s8  ;;  %s173_s20 = scalar_lea.vmem [#allocation5], %s430_s7 }
  0x34   : > { %p808_p11 = pnand %p938_p9, %p187_p12  ;;  %s182_s26 = sshll.u32 %s173_s20, 4  ;;  %s183_s26 = int_to_ptr.vmem [resolvable:$true] %s182_s26 }
  0x35   : > { %s170_s3 = scalar_lea.sflag [#allocation6], %s757_s25  ;;  %s553_s5 = scalar_lea.hbm %s815_s19, 128 }
  0x36   : > { %s939_s15 = scalar_select %p808_p11, 1, 0 }
  0x37   : > { %p554_p1 = scmp.ne.s32.totalorder %s815_s19, %s553_s5  ;;  %s558_s29 = scalar_lea.hbm %s929_s1, 256 }
  0x38   : > { %p559_p2 = scmp.lt.u32.totalorder %s815_s19, %s929_s1  ;;  %p560_p4 = scmp.lt.u32.totalorder %s558_s29, %s553_s5 }
  0x39   : > { %p556_p5 = pnand %p554_p1, %p525_p3  ;;  %p562_p7 = scmp.lt.u32.totalorder %s553_s5, %s815_s19 }
  0x3a   : > { %p561_p6 = por %p560_p4, %p559_p2 }
  0x3b   : > { %p557_p13 = pneg %p556_p5 }
  0x3c   : > { %p563_p10 = por %p562_p7, %p561_p6 }
  0x3e   : > { %p564_p12 = pnand %p563_p10, %p557_p13 }
  0x40   : > { %567 = shalt.err (!%p564_p12)
}
  0x41   : > { %s568_s25 = scalar_lea.vmem %s183_s26, 128  ;;  %s674_s7 = smov [#allocation5]  }
  0x42   : > { %p569_p9 = scmp.ne.s32.totalorder %s183_s26, %s568_s25  ;;  %s573_s8 = sshll.u32 %s674_s7, 4  ;;  %s574_s8 = int_to_ptr.vmem [resolvable:$false] %s573_s8 }
  0x43   : > { %s575_s16 = scalar_lea.vmem %s574_s8, 256  ;;  %p576_p8 = scmp.lt.s32.totalorder %s183_s26, %s574_s8 }
  0x44   : > { %p571_p1 = pnand %p569_p9, %p525_p3  ;;  %p577_p11 = scmp.lt.s32.totalorder %s575_s16, %s568_s25 }
  0x46   : > { %p572_p5 = pneg %p571_p1  ;;  %p578_p2 = por %p577_p11, %p576_p8 }
  0x48   : > { %p579_p4 = pnand %p578_p2, %p572_p5 }
  0x4a   : > { %582 = shalt.err (!%p579_p4)
}
  0x4b   : > { %465 = dma.hbm_to_vmem [thread:$0]  (!%p763_p0), %s815_s19, 128, %s183_s26, %s170_s3  }
  0x4c   : > { %p940_p13 = scmp.ne.s32.totalorder %s939_s15, 0 }
  0x4d   : > { %s840_s18 = sand.u32 (!%p940_p13), 1, %s653_s10   ;;  %p941_p8 = scmp.ne.s32.totalorder (!%p940_p13), %s934_s21, 0 }
  0x4e   : > { %191 = sbr.rel (%p940_p13) target bundleno = 128 (0x80), region = 28  ;;  %s194_s5 = scalar_lea.sflag (!%p940_p13), [#allocation3], %s840_s18 }
  0x4f   : > { %s452_s20 = smul.u32 (!%p940_p13), 96, %s840_s18 }
  0x51   : > { %s844_s6 = scalar_lea.vmem (!%p940_p13), [#allocation2], %s452_s20 }
  0x55   : > { %636 = dma.done.wait (%p941_p8), %s194_s5, 1536  }
  0x56   : > { %638 = vsyncadd (%p941_p8), %s194_s5, 4294965760  ;;  %s433_s28 = sshll.u32 %s840_s18, 3  ;;  %s203_s15 = scalar_lea.sflag [#allocation6], %s840_s18 }
  0x57   : > { %s854_s19 = scalar_lea.vmem [#allocation5], %s433_s28 }
  0x58   : > { %640 = dma.done.wait (%p941_p8), %s203_s15, 128  }
  0x59   : > { %642 = vsyncadd (%p941_p8), %s203_s15, 4294967168  ;;  %v241_v0 = vld [vmem:[%s844_s6] sm:$0xff]  ;;  %v435_v1 = vld [vmem:[%s844_s6 + $0x8] sm:$0xff]  ;;  %v675_v4 = vmov 0   ;;  %s447_s21 = sshll.u32 %s661_s12, 7  ;;  %s231_s26 = scalar_lea.vmem [#allocation7], %s433_s28 }
  0x5a   : > { %vm244_vm0 = vcmp.gt.f32.partialorder %v435_v1, %v241_v0  ;;  %v436_v2 = vld [vmem:[%s844_s6 + $0x10] sm:$0xff]  ;;  %v437_v6 = vld [vmem:[%s844_s6 + $0x18] sm:$0xff]  ;;  %v438_v9 = vld [vmem:[%s844_s6 + $0x20] sm:$0xff]  ;;  %s315_s3 = sshll.u32 %s231_s26, 4  ;;  %s879_s30 = scalar_lea.hbm %s930_s2, %s447_s21  ;;  %s881_s3 = int_to_ptr.vmem [resolvable:$true] %s315_s3 }
  0x5b   : > { %v245_v3 = vsel %vm244_vm0, %v435_v1, %v241_v0  ;;  %v246_v5 = vsel %vm244_vm0, 1, %v675_v4  ;;  %v439_v12 = vld [vmem:[%s844_s6 + $0x28] sm:$0xff]  ;;  %v440_v15 = vld [vmem:[%s844_s6 + $0x30] sm:$0xff]  ;;  %v441_v18 = vld [vmem:[%s844_s6 + $0x38] sm:$0xff]  ;;  %s301_s4 = scalar_lea.sflag [#allocation4], %s840_s18  ;;  %s583_s25 = scalar_lea.vmem %s881_s3, 128 }
  0x5c   : > { %vm249_vm1 = vcmp.gt.f32.partialorder %v436_v2, %v245_v3  ;;  %v442_v21 = vld [vmem:[%s844_s6 + $0x40] sm:$0xff]  ;;  %v443_v24 = vld [vmem:[%s844_s6 + $0x48] sm:$0xff]  ;;  %v444_v27 = vld [vmem:[%s844_s6 + $0x50] sm:$0xff]  ;;  %p584_p0 = scmp.ne.s32.totalorder %s881_s3, %s583_s25  ;;  %p942_p3 = scmp.ne.s32.totalorder %s935_s22, 0 }
  0x5d   : > { %v250_v7 = vsel %vm249_vm1, %v436_v2, %v245_v3  ;;  %v251_v8 = vsel %vm249_vm1, 2, %v246_v5  ;;  %v445_v30 = vld [vmem:[%s844_s6 + $0x58] sm:$0xff]  ;;  %v240_v31 = vld [vmem:[%s854_s19] sm:$0xff]  ;;  %s676_s12 = smov [#allocation7]  }
  0x5e   : > { %vm254_vm2 = vcmp.gt.f32.partialorder %v437_v6, %v250_v7  ;;  %p585_p11 = pnand %p584_p0, %p942_p3  ;;  %s587_s7 = sshll.u32 %s676_s12, 4  ;;  %s588_s7 = int_to_ptr.vmem [resolvable:$false] %s587_s7 }
  0x5f   : > { %v255_v10 = vsel %vm254_vm2, %v437_v6, %v250_v7  ;;  %v256_v11 = vsel %vm254_vm2, 3, %v251_v8  ;;  %s589_s8 = scalar_lea.vmem %s588_s7, 256  ;;  %p590_p7 = scmp.lt.s32.totalorder %s881_s3, %s588_s7 }
  0x60   : > { %vm259_vm3 = vcmp.gt.f32.partialorder %v438_v9, %v255_v10  ;;  %p586_p6 = pneg %p585_p11  ;;  %p591_p10 = scmp.lt.s32.totalorder %s589_s8, %s583_s25 }
  0x61   : > { %v260_v13 = vsel %vm259_vm3, %v438_v9, %v255_v10  ;;  %v261_v14 = vsel %vm259_vm3, 4, %v256_v11 }
  0x62   : > { %vm264_vm4 = vcmp.gt.f32.partialorder %v439_v12, %v260_v13  ;;  %p592_p12 = por %p591_p10, %p590_p7 }
  0x63   : > { %v265_v16 = vsel %vm264_vm4, %v439_v12, %v260_v13  ;;  %v266_v17 = vsel %vm264_vm4, 5, %v261_v14 }
  0x64   : > { %vm269_vm5 = vcmp.gt.f32.partialorder %v440_v15, %v265_v16  ;;  %p593_p9 = pnand %p592_p12, %p586_p6 }
  0x65   : > { %v270_v19 = vsel %vm269_vm5, %v440_v15, %v265_v16  ;;  %v271_v20 = vsel %vm269_vm5, 6, %v266_v17 }
  0x66   : > { %vm274_vm6 = vcmp.gt.f32.partialorder %v441_v18, %v270_v19 }
  0x67   : > { %v275_v22 = vsel %vm274_vm6, %v441_v18, %v270_v19  ;;  %v276_v23 = vsel %vm274_vm6, 7, %v271_v20 }
  0x68   : > { %vm279_vm7 = vcmp.gt.f32.partialorder %v442_v21, %v275_v22 }
  0x69   : > { %v280_v25 = vsel %vm279_vm7, %v442_v21, %v275_v22  ;;  %v281_v26 = vsel %vm279_vm7, 8, %v276_v23 }
  0x6a   : > { %vm284_vm8 = vcmp.gt.f32.partialorder %v443_v24, %v280_v25 }
  0x6b   : > { %v285_v28 = vsel %vm284_vm8, %v443_v24, %v280_v25  ;;  %v286_v29 = vsel %vm284_vm8, 9, %v281_v26 }
  0x6c   : > { %vm289_vm9 = vcmp.gt.f32.partialorder %v444_v27, %v285_v28 }
  0x6d   : > { %v290_v32 = vsel %vm289_vm9, %v444_v27, %v285_v28  ;;  %v291_v33 = vsel %vm289_vm9, 10, %v286_v29 }
  0x6e   : > { %vm294_vm10 = vcmp.gt.f32.partialorder %v445_v30, %v290_v32 }
  0x6f   : > { %v295_v34 = vsel %vm294_vm10, 11, %v291_v33 }
  0x70   : > { %vm296_vm11 = vcmp.eq.s32.totalorder %v295_v34, %v240_v31 }
  0x71   : > { %v297_v35 = vsel %vm296_vm11, 1, %v675_v4 }
  0x72   : > { %299 = vst [vmem:[%s231_s26] sm:$0xff] %v297_v35 }
  0x73   : > { %596 = shalt.err (!%p593_p9)
}
  0x74   : > { %s597_s16 = scalar_lea.hbm %s879_s30, 128  ;;  %s601_s5 = scalar_lea.hbm %s930_s2, 256 }
  0x75   : > { %p598_p1 = scmp.ne.s32.totalorder %s879_s30, %s597_s16  ;;  %p602_p4 = scmp.lt.u32.totalorder %s879_s30, %s930_s2 }
  0x76   : > { %p603_p13 = scmp.lt.u32.totalorder %s601_s5, %s597_s16  ;;  %p605_p0 = scmp.lt.u32.totalorder %s597_s16, %s879_s30 }
  0x77   : > { %p599_p5 = pnand %p598_p1, %p942_p3 }
  0x78   : > { %p604_p8 = por %p603_p13, %p602_p4 }
  0x79   : > { %p600_p2 = pneg %p599_p5 }
  0x7a   : > { %p606_p11 = por %p605_p0, %p604_p8 }
  0x7c   : > { %p607_p6 = pnand %p606_p11, %p600_p2 }
  0x7e   : > { %610 = shalt.err (!%p607_p6)
}
  0x7f   : > { %457 = dma.vmem_to_hbm [thread:$0]  (%p942_p3), %s881_s3, 128, %s879_s30, %s301_s4  }
  0x80 PF: > { %s327_s15 = sand.u32 1, %s649_s9   ;;  %p943_p7 = scmp.ne.s32.totalorder %s936_s24, 0 }
  0x81   : > { %p944_p10 = scmp.ge.s32.totalorder %s669_s14, 2  ;;  %s328_s19 = scalar_lea.sflag [#allocation4], %s327_s15 }
  0x83   : > { %p467_p12 = pnand %p944_p10, %p943_p7 }
  0x85   : > { %644 = dma.done.wait (!%p467_p12), %s328_s19, 128  }
  0x86   : > { %646 = vsyncadd (!%p467_p12), %s328_s19, 4294967168  ;;  %s21_s14 = sadd.s32 1, %s669_s14   ;;  %s945_s9 = smov %s653_s10 }
  0x87   : > { %p18_p9 = scmp.ge.s32.totalorder %s21_s14, 4   ;;  %s946_s10 = smov %s657_s11 }
  0x88   : > { %s947_s11 = smov %s748_s23  ;;  %s948_s12 = smov %s665_s13 }
  0x89   : > { %s949_s13 = smov %s951_s17  ;;  %20 = sbr.rel (!%p18_p9) target bundleno = 8 (0x8), region = 101 }
  0x90   :  { %333 = vsyncpa [#allocation3], 1 }
  0x91   :  { %335 = vsyncpa [#allocation3 + $0x1], 1 }
  0x92   :  { %336 = vsyncpa [#allocation6], 1 }
  0x93   :  { %338 = vsyncpa [#allocation6 + $0x1], 1 }
  0x94   :  { %339 = vsyncpa [#allocation4], 1 }
  0x95   :  { %341 = vsyncpa [#allocation4 + $0x1], 1 }

</bundles_post_ra>
